<compile_context>
chip_gen: v7x
topology: tpu7x:2x2x1
jax: 0.10.0
libtpu: 0.0.40
codegen_flags: <defaults>
</compile_context>

<pallas_src>
import jax
import jax.numpy as jnp
from jax import lax
from jax.experimental import pallas as pl
from jax.experimental.pallas import tpu as pltpu


def _basic_block_kernel(x_ref, t1_ref, b1_ref, t2_ref, b2_ref, o_ref,
                        xpad_s, mid_s):
    """Fused BasicBlock for one image (grid step n = image index).

    Folded layout: activations are 2-D (rows = H, lanes = W*C).

    Block shapes:
      x_ref  : (1, H, W*Cin)            f32   unpadded input (read once)
      t1_ref : (3, (W+2)*Cin, W*Cout)   bf16  conv1 Toeplitz RHS (BN1 scale folded)
      b1_ref : (1, W*Cout)              f32   BN1 bias, tiled over W
      t2_ref : (3, (W+2)*Cout, W*Cout)  bf16  conv2 Toeplitz RHS (BN2 scale folded)
      b2_ref : (1, W*Cout)              f32   BN2 bias, tiled over W
      o_ref  : (1, H, W*Cout)           bf16  output
      xpad_s : VMEM (H+2, (W+2)*Cin)    bf16  padded input slab
      mid_s  : VMEM (H+2, (W+2)*Cout)   bf16  padded conv1 activation slab
    """
    H = x_ref.shape[1]
    WCin = x_ref.shape[2]       # W * Cin
    WCout = o_ref.shape[2]      # W * Cout

    # Re-zero both padded scratches each step.  In the folded layout each slab
    # is ~2 packed vregs, so this is a couple of vector stores; doing it
    # unconditionally keeps the kernel correct when the parallel batch axis is
    # sharded across TensorCores (per-core scratch, no program_id==0 guarantee).
    xpad_s[...] = jnp.zeros(xpad_s.shape, xpad_s.dtype)
    mid_s[...] = jnp.zeros(mid_s.shape, mid_s.dtype)

    # Input block, read from HBM exactly once.  bf16 copy feeds the MXU; the
    # f32 original is reused for the (full-precision) residual.
    x_f32 = x_ref[0]                                   # (H, W*Cin) f32
    xpad_s[1:H + 1, 0:WCin] = x_f32.astype(xpad_s.dtype)
    # Lane columns [WCin, WCin+2*Cin) hold the left/right zero pad; the
    # Toeplitz RHS was built for exactly this row layout.

    # ---- conv1 + BN1 (scale folded into weights; bias seeds the acc) + ReLU ----
    # One MXU matmul per kh tap, K = (W+2)*Cin; kw and W are folded into the
    # contraction by the Toeplitz RHS.
    acc = jnp.broadcast_to(b1_ref[...], (H, WCout))    # f32
    for kh in range(3):
        acc = acc + jnp.dot(xpad_s[kh:kh + H, :], t1_ref[kh],
                            preferred_element_type=jnp.float32)
    hidden = jnp.maximum(acc, 0.0)                     # f32 ReLU

    # Intermediate activation stays in VMEM (never touches HBM); bf16 for conv2.
    mid_s[1:H + 1, 0:WCout] = hidden.astype(mid_s.dtype)

    # ---- conv2 + BN2 ----
    acc2 = jnp.broadcast_to(b2_ref[...], (H, WCout))   # f32
    for kh in range(3):
        acc2 = acc2 + jnp.dot(mid_s[kh:kh + H, :], t2_ref[kh],
                              preferred_element_type=jnp.float32)

    # ---- residual add (f32, PyTorch-faithful skip) + ReLU, bf16 store ----
    o_ref[0] = jnp.maximum(acc2 + x_f32, 0.0).astype(o_ref.dtype)


def _toeplitz_rhs(w_hwio, W):
    """(3,3,Cin,Cout) HWIO conv weights -> (3, (W+2)*Cin, W*Cout) Toeplitz RHS.

    Built for the kernel's padded-row layout: lanes [0, W*Cin) hold the real
    row, lanes [W*Cin, (W+2)*Cin) hold the left/right zero pad, so conv-with-
    padding along W becomes a single matmul per kh tap.  Runs at trace time
    only (weights are tiny)."""
    KH, KW, Cin, Cout = w_hwio.shape

    def lane_base(wpp):                 # start lane of padded column wpp
        if wpp == 0:                    # left pad
            return W * Cin
        if wpp == W + KW - 2:           # right pad (wpp == W+1)
            return (W + 1) * Cin
        return (wpp - 1) * Cin          # real columns 1..W -> lanes 0..W*Cin

    t = jnp.zeros((KH, (W + KW - 1) * Cin, W * Cout), w_hwio.dtype)
    for kw in range(KW):
        for w in range(W):
            r = lane_base(w + kw)
            t = t.at[:, r:r + Cin, w * Cout:(w + 1) * Cout].set(w_hwio[:, kw])
    return t


def basic_block_fused(x_nhwc, params):
    """y = relu(bn2(conv3x3(relu(bn1(conv3x3(x))))) + x), NHWC, one pallas_call."""
    N, H, W, Cin = x_nhwc.shape
    Cout = params["w1"].shape[-1]
    assert Cin == Cout, "BasicBlock with downsample=None requires inplanes == planes"

    # Fold eval-mode BN scale into conv weights (conv is linear per out-channel),
    # then expand to the Toeplitz MXU RHS.  Biases are tiled over W to match the
    # folded (H, W*C) layout.
    w1 = (params["w1"] * params["scale1"]).astype(jnp.bfloat16)
    w2 = (params["w2"] * params["scale2"]).astype(jnp.bfloat16)
    t1 = _toeplitz_rhs(w1, W)                                   # (3,(W+2)*Cin, W*Cout)
    t2 = _toeplitz_rhs(w2, W)                                   # (3,(W+2)*Cout,W*Cout)
    b1 = jnp.tile(params["bias1"].astype(jnp.float32), W).reshape(1, W * Cout)
    b2 = jnp.tile(params["bias2"].astype(jnp.float32), W).reshape(1, W * Cout)

    # No jnp.pad, no separate bf16 cast: x goes to the kernel unpadded in f32
    # (the (N,H,W,C)->(N,H,W*C) reshape is metadata-only).
    xf = x_nhwc.reshape(N, H, W * Cin)

    out = pl.pallas_call(
        _basic_block_kernel,
        out_shape=jax.ShapeDtypeStruct((N, H, W * Cout), jnp.bfloat16),
        grid=(N,),
        in_specs=[
            pl.BlockSpec((1, H, W * Cin), lambda n: (n, 0, 0)),
            pl.BlockSpec((3, (W + 2) * Cin, W * Cout), lambda n: (0, 0, 0)),
            pl.BlockSpec((1, W * Cout), lambda n: (0, 0)),
            pl.BlockSpec((3, (W + 2) * Cout, W * Cout), lambda n: (0, 0, 0)),
            pl.BlockSpec((1, W * Cout), lambda n: (0, 0)),
        ],
        out_specs=pl.BlockSpec((1, H, W * Cout), lambda n: (n, 0, 0)),
        scratch_shapes=[
            pltpu.VMEM((H + 2, (W + 2) * Cin), jnp.bfloat16),
            pltpu.VMEM((H + 2, (W + 2) * Cout), jnp.bfloat16),
        ],
        compiler_params=pltpu.CompilerParams(
            dimension_semantics=("parallel",)),
    )(xf, t1, b1, t2, b2)
    return out.reshape(N, H, W, Cout)


def fold_bn(gamma, beta, running_mean, running_var, eps=1e-5):
    """Fold eval-mode BatchNorm into per-channel (scale, bias)."""
    scale = gamma / jnp.sqrt(running_var + eps)
    bias = beta - running_mean * scale
    return scale, bias


def init_basic_block_params(key, inplanes, planes):
    k1, k2 = jax.random.split(key)
    w1 = jax.random.normal(k1, (3, 3, inplanes, planes), jnp.float32) * 0.1
    w2 = jax.random.normal(k2, (3, 3, planes, planes), jnp.float32) * 0.1
    c = jnp.arange(planes, dtype=jnp.float32)
    gamma1, beta1 = 1.0 + 0.1 * c, 0.05 * c
    mean1, var1 = 0.01 * c, 1.0 + 0.2 * c
    gamma2, beta2 = 1.0 - 0.05 * c, -0.02 * c
    mean2, var2 = -0.01 * c, 1.0 + 0.1 * c
    s1, b1 = fold_bn(gamma1, beta1, mean1, var1)
    s2, b2 = fold_bn(gamma2, beta2, mean2, var2)
    return dict(w1=w1, scale1=s1, bias1=b1, w2=w2, scale2=s2, bias2=b2)


@jax.jit
def basic_block_forward(x_nchw, params):
    """BasicBlock forward; NCHW f32 in/out to match PyTorch.  (When stacking
    blocks, keep activations in the folded bf16 NHWC layout end-to-end and drop
    these boundary transposes/casts.)"""
    x = jnp.transpose(x_nchw, (0, 2, 3, 1))       # NCHW -> NHWC
    out = basic_block_fused(x, params)            # (N, H, W, Cout) bf16
    return jnp.transpose(out, (0, 3, 1, 2)).astype(jnp.float32)


def _reference_forward(x_nchw, params):
    """Pure-JAX reference using the kernel's precision policy: bf16 matmul
    operands, f32 accumulation/epilogue, f32 residual; output compared after
    the kernel's bf16 store rounding via tolerance."""
    rb = lambda a: a.astype(jnp.bfloat16).astype(jnp.float32)   # round to bf16
    x = jnp.transpose(x_nchw, (0, 2, 3, 1))
    w1 = rb(params["w1"] * params["scale1"])
    w2 = rb(params["w2"] * params["scale2"])
    dn = lax.conv_dimension_numbers(x.shape, w1.shape, ("NHWC", "HWIO", "NHWC"))

    def conv(a, w):
        return lax.conv_general_dilated(a, w, (1, 1), ((1, 1), (1, 1)),
                                        dimension_numbers=dn,
                                        precision=lax.Precision.HIGHEST)

    h = jnp.maximum(conv(rb(x), w1) + params["bias1"], 0.0)
    out = conv(rb(h), w2) + params["bias2"] + x      # f32 residual
    out = jnp.maximum(out, 0.0)
    return jnp.transpose(out, (0, 3, 1, 2))


if __name__ == "__main__":
    key = jax.random.PRNGKey(0)
    kx, kp = jax.random.split(key)

    N, C, H, W = 2, 4, 16, 16   # inplanes = planes = 4, stride = 1
    x = jax.random.normal(kx, (N, C, H, W), jnp.float32)
    params = init_basic_block_params(kp, inplanes=C, planes=C)

    out = jax.block_until_ready(basic_block_forward(x, params))
    ref = _reference_forward(x, params)

    assert out.shape == (N, C, H, W)
    assert jnp.allclose(out, ref, atol=2e-2, rtol=2e-2), (
        f"mismatch vs reference (max abs err {jnp.max(jnp.abs(out - ref))})")

    print("KERNEL_OK")
</pallas_src>

<mosaic_0001>
module attributes {stable_mosaic.version = 11 : i64} {
  func.func @_basic_block_kernel(%arg0: i32, %arg1: memref<1x16x64xf32, #tpu.memory_space<vmem>>, %arg2: memref<3x72x64xbf16, #tpu.memory_space<vmem>>, %arg3: memref<1x64xf32, #tpu.memory_space<vmem>>, %arg4: memref<3x72x64xbf16, #tpu.memory_space<vmem>>, %arg5: memref<1x64xf32, #tpu.memory_space<vmem>>, %arg6: memref<1x16x64xbf16, #tpu.memory_space<vmem>>, %arg7: memref<18x72xbf16, #tpu.memory_space<vmem>>, %arg8: memref<18x72xbf16, #tpu.memory_space<vmem>>) attributes {dimension_semantics = [#tpu.dimension_semantics<parallel>], iteration_bounds = array<i64: 2>, scalar_prefetch = 0 : i64, scratch_operands = 2 : i64, tpu.core_type = #tpu.core_type<tc>, window_params = [{transform_indices = @transform_0, window_bounds = array<i64: 1, 16, 64>}, {pipeline_mode = #tpu.pipeline_mode<synchronous>, transform_indices = @transform_1, window_bounds = array<i64: 3, 72, 64>}, {pipeline_mode = #tpu.pipeline_mode<synchronous>, transform_indices = @transform_2, window_bounds = array<i64: 1, 64>}, {pipeline_mode = #tpu.pipeline_mode<synchronous>, transform_indices = @transform_3, window_bounds = array<i64: 3, 72, 64>}, {pipeline_mode = #tpu.pipeline_mode<synchronous>, transform_indices = @transform_4, window_bounds = array<i64: 1, 64>}, {transform_indices = @transform_5, window_bounds = array<i64: 1, 16, 64>}]} {
    %cst = arith.constant 0.000000e+00 : bf16
    %0 = vector.broadcast %cst : bf16 to vector<18x72xbf16>
    %c0 = arith.constant 0 : index
    %c0_0 = arith.constant 0 : index
    %1 = vector.load %arg7[%c0, %c0_0] : memref<18x72xbf16, #tpu.memory_space<vmem>>, vector<18x72xbf16>
    tpu.vector_store %arg7[%c0, %c0_0], %0 {strides = array<i32>} : memref<18x72xbf16, #tpu.memory_space<vmem>>, vector<18x72xbf16>,
    %cst_1 = arith.constant 0.000000e+00 : bf16
    %2 = vector.broadcast %cst_1 : bf16 to vector<18x72xbf16>
    %c0_2 = arith.constant 0 : index
    %c0_3 = arith.constant 0 : index
    %3 = vector.load %arg8[%c0_2, %c0_3] : memref<18x72xbf16, #tpu.memory_space<vmem>>, vector<18x72xbf16>
    tpu.vector_store %arg8[%c0_2, %c0_3], %2 {strides = array<i32>} : memref<18x72xbf16, #tpu.memory_space<vmem>>, vector<18x72xbf16>,
    %c0_4 = arith.constant 0 : index
    %c0_5 = arith.constant 0 : index
    %c0_6 = arith.constant 0 : index
    %4 = vector.load %arg1[%c0_4, %c0_5, %c0_6] : memref<1x16x64xf32, #tpu.memory_space<vmem>>, vector<1x16x64xf32>
    %5 = vector.shape_cast %4 : vector<1x16x64xf32> to vector<16x64xf32>
    %6 = arith.truncf %5 : vector<16x64xf32> to vector<16x64xbf16>
    %c1 = arith.constant 1 : index
    %c0_7 = arith.constant 0 : index
    %7 = vector.load %arg7[%c1, %c0_7] : memref<18x72xbf16, #tpu.memory_space<vmem>>, vector<16x64xbf16>
    tpu.vector_store %arg7[%c1, %c0_7], %6 {strides = array<i32>} : memref<18x72xbf16, #tpu.memory_space<vmem>>, vector<16x64xbf16>,
    %c0_8 = arith.constant 0 : index
    %c0_9 = arith.constant 0 : index
    %8 = vector.load %arg3[%c0_8, %c0_9] : memref<1x64xf32, #tpu.memory_space<vmem>>, vector<1x64xf32>
    %9 = vector.shape_cast %8 : vector<1x64xf32> to vector<1x64xf32>
    %10 = vector.broadcast %9 : vector<1x64xf32> to vector<16x64xf32>
    %c0_10 = arith.constant 0 : index
    %c0_11 = arith.constant 0 : index
    %11 = vector.load %arg7[%c0_10, %c0_11] : memref<18x72xbf16, #tpu.memory_space<vmem>>, vector<16x72xbf16>
    %c0_12 = arith.constant 0 : index
    %c0_13 = arith.constant 0 : index
    %c0_14 = arith.constant 0 : index
    %12 = vector.load %arg2[%c0_12, %c0_13, %c0_14] : memref<3x72x64xbf16, #tpu.memory_space<vmem>>, vector<1x72x64xbf16>
    %13 = vector.shape_cast %12 : vector<1x72x64xbf16> to vector<72x64xbf16>
    %cst_15 = arith.constant dense<0.000000e+00> : vector<16x64xf32>
    %14 = tpu.matmul %11, %13, %cst_15 {dimension_numbers = #tpu.dot_dimension_numbers<[1], [0], [0], [1], [0, 0, 1, 1], [], []>} : vector<16x72xbf16>, vector<72x64xbf16>, vector<16x64xf32> -> vector<16x64xf32>
    %15 = arith.addf %10, %14 : vector<16x64xf32>
    %c1_16 = arith.constant 1 : index
    %c0_17 = arith.constant 0 : index
    %16 = vector.load %arg7[%c1_16, %c0_17] : memref<18x72xbf16, #tpu.memory_space<vmem>>, vector<16x72xbf16>
    %c1_18 = arith.constant 1 : index
    %c0_19 = arith.constant 0 : index
    %c0_20 = arith.constant 0 : index
    %17 = vector.load %arg2[%c1_18, %c0_19, %c0_20] : memref<3x72x64xbf16, #tpu.memory_space<vmem>>, vector<1x72x64xbf16>
    %18 = vector.shape_cast %17 : vector<1x72x64xbf16> to vector<72x64xbf16>
    %cst_21 = arith.constant dense<0.000000e+00> : vector<16x64xf32>
    %19 = tpu.matmul %16, %18, %cst_21 {dimension_numbers = #tpu.dot_dimension_numbers<[1], [0], [0], [1], [0, 0, 1, 1], [], []>} : vector<16x72xbf16>, vector<72x64xbf16>, vector<16x64xf32> -> vector<16x64xf32>
    %20 = arith.addf %15, %19 : vector<16x64xf32>
    %c2 = arith.constant 2 : index
    %c0_22 = arith.constant 0 : index
    %21 = vector.load %arg7[%c2, %c0_22] : memref<18x72xbf16, #tpu.memory_space<vmem>>, vector<16x72xbf16>
    %c2_23 = arith.constant 2 : index
    %c0_24 = arith.constant 0 : index
    %c0_25 = arith.constant 0 : index
    %22 = vector.load %arg2[%c2_23, %c0_24, %c0_25] : memref<3x72x64xbf16, #tpu.memory_space<vmem>>, vector<1x72x64xbf16>
    %23 = vector.shape_cast %22 : vector<1x72x64xbf16> to vector<72x64xbf16>
    %cst_26 = arith.constant dense<0.000000e+00> : vector<16x64xf32>
    %24 = tpu.matmul %21, %23, %cst_26 {dimension_numbers = #tpu.dot_dimension_numbers<[1], [0], [0], [1], [0, 0, 1, 1], [], []>} : vector<16x72xbf16>, vector<72x64xbf16>, vector<16x64xf32> -> vector<16x64xf32>
    %25 = arith.addf %20, %24 : vector<16x64xf32>
    %cst_27 = arith.constant 0.000000e+00 : f32
    %26 = vector.broadcast %cst_27 : f32 to vector<16x64xf32>
    %27 = arith.maximumf %25, %26 : vector<16x64xf32>
    %28 = arith.truncf %27 : vector<16x64xf32> to vector<16x64xbf16>
    %c1_28 = arith.constant 1 : index
    %c0_29 = arith.constant 0 : index
    %29 = vector.load %arg8[%c1_28, %c0_29] : memref<18x72xbf16, #tpu.memory_space<vmem>>, vector<16x64xbf16>
    tpu.vector_store %arg8[%c1_28, %c0_29], %28 {strides = array<i32>} : memref<18x72xbf16, #tpu.memory_space<vmem>>, vector<16x64xbf16>,
    %c0_30 = arith.constant 0 : index
    %c0_31 = arith.constant 0 : index
    %30 = vector.load %arg5[%c0_30, %c0_31] : memref<1x64xf32, #tpu.memory_space<vmem>>, vector<1x64xf32>
    %31 = vector.shape_cast %30 : vector<1x64xf32> to vector<1x64xf32>
    %32 = vector.broadcast %31 : vector<1x64xf32> to vector<16x64xf32>
    %c0_32 = arith.constant 0 : index
    %c0_33 = arith.constant 0 : index
    %33 = vector.load %arg8[%c0_32, %c0_33] : memref<18x72xbf16, #tpu.memory_space<vmem>>, vector<16x72xbf16>
    %c0_34 = arith.constant 0 : index
    %c0_35 = arith.constant 0 : index
    %c0_36 = arith.constant 0 : index
    %34 = vector.load %arg4[%c0_34, %c0_35, %c0_36] : memref<3x72x64xbf16, #tpu.memory_space<vmem>>, vector<1x72x64xbf16>
    %35 = vector.shape_cast %34 : vector<1x72x64xbf16> to vector<72x64xbf16>
    %cst_37 = arith.constant dense<0.000000e+00> : vector<16x64xf32>
    %36 = tpu.matmul %33, %35, %cst_37 {dimension_numbers = #tpu.dot_dimension_numbers<[1], [0], [0], [1], [0, 0, 1, 1], [], []>} : vector<16x72xbf16>, vector<72x64xbf16>, vector<16x64xf32> -> vector<16x64xf32>
    %37 = arith.addf %32, %36 : vector<16x64xf32>
    %c1_38 = arith.constant 1 : index
    %c0_39 = arith.constant 0 : index
    %38 = vector.load %arg8[%c1_38, %c0_39] : memref<18x72xbf16, #tpu.memory_space<vmem>>, vector<16x72xbf16>
    %c1_40 = arith.constant 1 : index
    %c0_41 = arith.constant 0 : index
    %c0_42 = arith.constant 0 : index
    %39 = vector.load %arg4[%c1_40, %c0_41, %c0_42] : memref<3x72x64xbf16, #tpu.memory_space<vmem>>, vector<1x72x64xbf16>
    %40 = vector.shape_cast %39 : vector<1x72x64xbf16> to vector<72x64xbf16>
    %cst_43 = arith.constant dense<0.000000e+00> : vector<16x64xf32>
    %41 = tpu.matmul %38, %40, %cst_43 {dimension_numbers = #tpu.dot_dimension_numbers<[1], [0], [0], [1], [0, 0, 1, 1], [], []>} : vector<16x72xbf16>, vector<72x64xbf16>, vector<16x64xf32> -> vector<16x64xf32>
    %42 = arith.addf %37, %41 : vector<16x64xf32>
    %c2_44 = arith.constant 2 : index
    %c0_45 = arith.constant 0 : index
    %43 = vector.load %arg8[%c2_44, %c0_45] : memref<18x72xbf16, #tpu.memory_space<vmem>>, vector<16x72xbf16>
    %c2_46 = arith.constant 2 : index
    %c0_47 = arith.constant 0 : index
    %c0_48 = arith.constant 0 : index
    %44 = vector.load %arg4[%c2_46, %c0_47, %c0_48] : memref<3x72x64xbf16, #tpu.memory_space<vmem>>, vector<1x72x64xbf16>
    %45 = vector.shape_cast %44 : vector<1x72x64xbf16> to vector<72x64xbf16>
    %cst_49 = arith.constant dense<0.000000e+00> : vector<16x64xf32>
    %46 = tpu.matmul %43, %45, %cst_49 {dimension_numbers = #tpu.dot_dimension_numbers<[1], [0], [0], [1], [0, 0, 1, 1], [], []>} : vector<16x72xbf16>, vector<72x64xbf16>, vector<16x64xf32> -> vector<16x64xf32>
    %47 = arith.addf %42, %46 : vector<16x64xf32>
    %48 = arith.addf %47, %5 : vector<16x64xf32>
    %cst_50 = arith.constant 0.000000e+00 : f32
    %49 = vector.broadcast %cst_50 : f32 to vector<16x64xf32>
    %50 = arith.maximumf %48, %49 : vector<16x64xf32>
    %51 = arith.truncf %50 : vector<16x64xf32> to vector<16x64xbf16>
    %c0_51 = arith.constant 0 : index
    %c0_52 = arith.constant 0 : index
    %c0_53 = arith.constant 0 : index
    %52 = vector.load %arg6[%c0_51, %c0_52, %c0_53] : memref<1x16x64xbf16, #tpu.memory_space<vmem>>, vector<1x16x64xbf16>
    %53 = vector.shape_cast %52 : vector<1x16x64xbf16> to vector<16x64xbf16>
    %54 = vector.shape_cast %51 : vector<16x64xbf16> to vector<1x16x64xbf16>
    tpu.vector_store %arg6[%c0_51, %c0_52, %c0_53], %54 {strides = array<i32>} : memref<1x16x64xbf16, #tpu.memory_space<vmem>>, vector<1x16x64xbf16>,
    return
  }
  func.func @transform_0(%arg0: i32) -> (i32, i32, i32) {
    %c0_i32 = arith.constant 0 : i32
    %c0_i32_0 = arith.constant 0 : i32
    %c0_i32_1 = arith.constant 0 : i32
    return %arg0, %c0_i32, %c0_i32_0 : i32, i32, i32
  }
  func.func @transform_1(%arg0: i32) -> (i32, i32, i32) {
    %c0_i32 = arith.constant 0 : i32
    %c0_i32_0 = arith.constant 0 : i32
    %c0_i32_1 = arith.constant 0 : i32
    %c0_i32_2 = arith.constant 0 : i32
    return %c0_i32, %c0_i32_0, %c0_i32_1 : i32, i32, i32
  }
  func.func @transform_2(%arg0: i32) -> (i32, i32) {
    %c0_i32 = arith.constant 0 : i32
    %c0_i32_0 = arith.constant 0 : i32
    %c0_i32_1 = arith.constant 0 : i32
    return %c0_i32, %c0_i32_0 : i32, i32
  }
  func.func @transform_3(%arg0: i32) -> (i32, i32, i32) {
    %c0_i32 = arith.constant 0 : i32
    %c0_i32_0 = arith.constant 0 : i32
    %c0_i32_1 = arith.constant 0 : i32
    %c0_i32_2 = arith.constant 0 : i32
    return %c0_i32, %c0_i32_0, %c0_i32_1 : i32, i32, i32
  }
  func.func @transform_4(%arg0: i32) -> (i32, i32) {
    %c0_i32 = arith.constant 0 : i32
    %c0_i32_0 = arith.constant 0 : i32
    %c0_i32_1 = arith.constant 0 : i32
    return %c0_i32, %c0_i32_0 : i32, i32
  }
  func.func @transform_5(%arg0: i32) -> (i32, i32, i32) {
    %c0_i32 = arith.constant 0 : i32
    %c0_i32_0 = arith.constant 0 : i32
    %c0_i32_1 = arith.constant 0 : i32
    return %arg0, %c0_i32, %c0_i32_0 : i32, i32, i32
  }
}

</mosaic_0001>

<bundles_post_ra>
// kernel: tile.13
= control target key start
LH: loop header
LB: loop body
LE: loop exit
PB: predicated region body
PF: predicated region fallthrough
CT: control target
= control target key end

     0   :  { %s28_s0 = inlined_call_operand.vmem [shape: f32[4], index: 0, kind: input, shape index: {}]   ;;  %s29_s1 = inlined_call_operand.vmem [shape: f32[16,4], index: 1, kind: output, shape index: {}]  }
   0x1   :  { %v4_v0 = vld [vmem:[%s28_s0] ss:$0 sm:$0xff] }
   0x2   :  { %5 = vst [vmem:[%s29_s1] sm:$0xff] %v4_v0  ;;  %8 = vst [vmem:[%s29_s1 + $0x8] sm:$0xff] %v4_v0 }

// kernel: tile.14
= control target key start
LH: loop header
LB: loop body
LE: loop exit
PB: predicated region body
PF: predicated region fallthrough
CT: control target
= control target key end

     0   :  { %s131_s10 = smov 60   ;;  %s132_s11 = smov 52   ;;  %vm3_vm0 = vcmask 31744   ;;  %vm9_vm1 = vcmask 523744   ;;  %vm15_vm2 = vcmask 490944   ;;  %vm21_vm3 = vcmask 458144   ;;  %s207_s0 = inlined_call_operand.vmem [shape: f32[16,4], index: 0, kind: input, shape index: {}]   ;;  %s208_s1 = inlined_call_operand.vmem [shape: f32[1,64], index: 1, kind: output, shape index: {}]  }
   0x1   :  { %v101_v0 = vld [vmem:[%s207_s0 + $0xf] sm:$0x1]   ;;  %v103_v1 = vld [vmem:[%s207_s0 + $0xd] sm:$0x1]   ;;  %v102_v2 = vld [vmem:[%s207_s0 + $0xe] sm:$0x1]  }
   0x2   :  { %7 = vrot.lane.b32.xlu0 %v101_v0, %s131_s10  ;;  %19 = vrot.lane.b32.xlu1 %v103_v1, %s132_s11  ;;  %v104_v3 = vld [vmem:[%s207_s0 + $0xc] sm:$0x1]   ;;  %s133_s16 = smov 56   ;;  %s134_s17 = smov 48   ;;  %v105_v4 = vld [vmem:[%s207_s0 + $0xb] sm:$0x1]  }
   0x3   :  { %v106_v5 = vld [vmem:[%s207_s0 + $0xa] sm:$0x1]   ;;  %v2_v6 = vld [vmem:[%s207_s0] sm:$0x1]   ;;  %s135_s24 = smov 44   ;;  %s136_s25 = smov 40  }
   0x4   :  { %4 = vst.msk [vmem:[#allocation0] sm:$0x1] %vm3_vm0, %v2_v6   ;;  %v107_v7 = vld [vmem:[%s207_s0 + $0x9] sm:$0x1]   ;;  %v108_v8 = vld [vmem:[%s207_s0 + $0x8] sm:$0x1]  }
   0x5   :  { %s137_s30 = smov 36   ;;  %s138_s2 = smov 32   ;;  %v109_v9 = vld [vmem:[%s207_s0 + $0x7] sm:$0x1]   ;;  %v110_v10 = vld [vmem:[%s207_s0 + $0x6] sm:$0x1]  }
   0x6   :  { %13 = vrot.lane.b32.xlu0 %v102_v2, %s133_s16  ;;  %25 = vrot.lane.b32.xlu1 %v104_v3, %s134_s17  ;;  %s139_s7 = smov 28   ;;  %s140_s8 = smov 24   ;;  %v111_v11 = vld [vmem:[%s207_s0 + $0x5] sm:$0x1]   ;;  %v112_v12 = vld [vmem:[%s207_s0 + $0x4] sm:$0x1]  }
   0x7   :  { %s141_s13 = smov 20   ;;  %s142_s14 = smov 16   ;;  %v113_v13 = vld [vmem:[%s207_s0 + $0x3] sm:$0x1]   ;;  %v114_v14 = vld [vmem:[%s207_s0 + $0x2] sm:$0x1]  }
   0x8   :  { %s143_s19 = smov 12   ;;  %s144_s20 = smov 8   ;;  %v115_v15 = vld [vmem:[%s207_s0 + $0x1] sm:$0x1]   ;;  %vm27_vm4 = vcmask 425344   ;;  %vm33_vm5 = vcmask 392544  }
   0x9   :  { %s145_s0 = smov 4   ;;  %vm39_vm6 = vcmask 359744   ;;  %vm45_vm7 = vcmask 326944   ;;  %vm51_vm8 = vcmask 294144   ;;  %vm57_vm9 = vcmask 261344  }
   0xa   :  { %31 = vrot.lane.b32.xlu0 %v105_v4, %s135_s24  ;;  %37 = vrot.lane.b32.xlu1 %v106_v5, %s136_s25  ;;  %vm63_vm10 = vcmask 228544   ;;  %vm69_vm11 = vcmask 195744   ;;  %vm75_vm12 = vcmask 162944   ;;  %vm81_vm13 = vcmask 130144  }
   0xb   :  { %vm87_vm14 = vcmask 97344   ;;  %vm93_vm15 = vcmask 64544  }
   0xe   :  { %43 = vrot.lane.b32.xlu0 %v107_v7, %s137_s30  ;;  %49 = vrot.lane.b32.xlu1 %v108_v8, %s138_s2 }
  0x12   :  { %55 = vrot.lane.b32.xlu0 %v109_v9, %s139_s7  ;;  %61 = vrot.lane.b32.xlu1 %v110_v10, %s140_s8 }
  0x16   :  { %67 = vrot.lane.b32.xlu0 %v111_v11, %s141_s13  ;;  %73 = vrot.lane.b32.xlu1 %v112_v12, %s142_s14 }
  0x1a   :  { %79 = vrot.lane.b32.xlu0 %v113_v13, %s143_s19  ;;  %85 = vrot.lane.b32.xlu1 %v114_v14, %s144_s20 }
  0x1e   :  { %91 = vrot.lane.b32.xlu0 %v115_v15, %s145_s0 }
  0x74   :  { %v8_v16 = vpop.permute.xlu0 %7   ;;  %v20_v17 = vpop.permute.xlu1 %19  }
  0x75   :  { %10 = vst.msk [vmem:[#allocation0] sm:$0x1] %vm9_vm1, %v8_v16  }
  0x78   :  { %v14_v18 = vpop.permute.xlu0 %13   ;;  %v26_v19 = vpop.permute.xlu1 %25  }
  0x79   :  { %16 = vst.msk [vmem:[#allocation0] sm:$0x1] %vm15_vm2, %v14_v18  }
  0x7a   :  { %22 = vst.msk [vmem:[#allocation0] sm:$0x1] %vm21_vm3, %v20_v17  }
  0x7b   :  { %28 = vst.msk [vmem:[#allocation0] sm:$0x1] %vm27_vm4, %v26_v19  }
  0x7c   :  { %v32_v20 = vpop.permute.xlu0 %31   ;;  %v38_v21 = vpop.permute.xlu1 %37  }
  0x7d   :  { %34 = vst.msk [vmem:[#allocation0] sm:$0x1] %vm33_vm5, %v32_v20  }
  0x7e   :  { %40 = vst.msk [vmem:[#allocation0] sm:$0x1] %vm39_vm6, %v38_v21  }
  0x80   :  { %v44_v22 = vpop.permute.xlu0 %43   ;;  %v50_v23 = vpop.permute.xlu1 %49  }
  0x81   :  { %46 = vst.msk [vmem:[#allocation0] sm:$0x1] %vm45_vm7, %v44_v22  }
  0x82   :  { %52 = vst.msk [vmem:[#allocation0] sm:$0x1] %vm51_vm8, %v50_v23  }
  0x84   :  { %v56_v24 = vpop.permute.xlu0 %55   ;;  %v62_v25 = vpop.permute.xlu1 %61  }
  0x85   :  { %58 = vst.msk [vmem:[#allocation0] sm:$0x1] %vm57_vm9, %v56_v24  }
  0x86   :  { %64 = vst.msk [vmem:[#allocation0] sm:$0x1] %vm63_vm10, %v62_v25  }
  0x88   :  { %v68_v26 = vpop.permute.xlu0 %67   ;;  %v74_v27 = vpop.permute.xlu1 %73  }
  0x89   :  { %70 = vst.msk [vmem:[#allocation0] sm:$0x1] %vm69_vm11, %v68_v26  }
  0x8a   :  { %76 = vst.msk [vmem:[#allocation0] sm:$0x1] %vm75_vm12, %v74_v27  }
  0x8c   :  { %v80_v28 = vpop.permute.xlu0 %79   ;;  %v86_v29 = vpop.permute.xlu1 %85  }
  0x8d   :  { %82 = vst.msk [vmem:[#allocation0] sm:$0x1] %vm81_vm13, %v80_v28  }
  0x8e   :  { %88 = vst.msk [vmem:[#allocation0] sm:$0x1] %vm87_vm14, %v86_v29  }
  0x90   :  { %v92_v30 = vpop.permute.xlu0 %91  }
  0x91   :  { %94 = vst.msk [vmem:[#allocation0] sm:$0x1] %vm93_vm15, %v92_v30  }
  0x98   :  { %v98_v31 = vld [vmem:[#allocation0] sm:$0x1] }
  0x99   :  { %100 = vst [vmem:[%s208_s1] sm:$0x1] %v98_v31 }

// kernel: basic_block_forward.1
= control target key start
LH: loop header
LB: loop body
LE: loop exit
PB: predicated region body
PF: predicated region fallthrough
CT: control target
= control target key end

     0   :  { %s1314_s18 = smov 0   ;;  %s1530_s0 = inlined_call_operand.vmem [shape: f32[2,16,64], index: 0, kind: input, shape index: {}]   ;;  %s1531_s1 = inlined_call_operand.vmem [shape: bf16[3,72,64], index: 1, kind: input, shape index: {}]   ;;  %s1532_s2 = inlined_call_operand.vmem [shape: f32[1,64], index: 2, kind: input, shape index: {}]   ;;  %s1533_s3 = inlined_call_operand.vmem [shape: bf16[3,72,64], index: 3, kind: input, shape index: {}]   ;;  %s1534_s4 = inlined_call_operand.vmem [shape: f32[1,64], index: 4, kind: input, shape index: {}]   ;;  %s1535_s5 = inlined_call_operand.vmem [shape: bf16[2,16,64], index: 5, kind: output, shape index: {}]  }
   0x1 LB: > { %s988_s19 = sadd.s32 4294967295, %s1279_s18   ;;  %p992_p0 = scmp.ge.s32.totalorder %s1279_s18, 1  ;;  %s1279_s18 = sphi %s1314_s18, %s15_s18  }
   0x2   : > { %p187_p1 = scmp.lt.s32.totalorder %s1279_s18, 3 }
   0x4   : > { %p188_p2 = pnand %p992_p0, %p187_p1 }
   0x5   : > { %v1236_v0 = vld [vmem:[%s1531_s1] sm:$0xff] (!%p188_p2)   ;;  %v1281_v1 = vmov (!%p188_p2), 0.0   ;;  %v1237_v2 = vld [vmem:[%s1531_s1 + $0x8] sm:$0xff] (!%p188_p2)   ;;  %vm1282_vm0 = vmmov (!%p188_p2), 0   ;;  %p215_p3 = scmp.lt.s32.totalorder (!%p188_p2), %s988_s19, 1  ;;  %vm226_vm1 = vcmask (!%p188_p2), 584704  }
   0x6   : > { %191 = sbr.rel (%p188_p2) target bundleno = 572 (0x23c), region = 40  ;;  %1131 = vmatprep.subr.bf16.mxu0 (!%p188_p2), %v1281_v1  ;;  %1173 = vmatprep.subr.bf16.mxu1 (!%p188_p2), %v1281_v1  ;;  %v1283_v3 = vmov (!%p188_p2), 0   ;;  %v1238_v4 = vld [vmem:[%s1531_s1 + $0x10] sm:$0xff] (!%p188_p2)   ;;  %vm229_vm2 = vcmask (!%p188_p2), 581632   ;;  %v1240_v5 = vld [vmem:[%s1531_s1 + $0x20] ss:$0 sps:$4 sm:$0xff] (!%p188_p2)  }
   0x7   : > { %1132 = vmatpush3.bf16.msra.mxu0 (!%p188_p2), %v1236_v0  ;;  %1141 = vmatprep.mubr.msk.bf16.mxu0 (!%p188_p2), %vm1282_vm0, %v1281_v1  ;;  %227 = vst.msk [vmem:[#allocation2] sm:$0xf] (!%p188_p2), %vm226_vm1, %v1283_v3  ;;  %228 = vst.msk [vmem:[#allocation2 + $0x4] sm:$0xf] (!%p188_p2), %vm226_vm1, %v1283_v3  ;;  %vm242_vm3 = vsmask.f32 (!%p188_p2), 256 }
   0x8   : > { %1133 = vmatprep.subr.bf16.mxu0 (!%p188_p2), %v1281_v1  ;;  %1183 = vmatprep.mubr.msk.bf16.mxu1 (!%p188_p2), %vm1282_vm0, %v1281_v1  ;;  %231 = vst.msk [vmem:[#allocation3] sm:$0xf] (!%p188_p2), %vm226_vm1, %v1283_v3  ;;  %232 = vst.msk [vmem:[#allocation3 + $0x4] sm:$0xf] (!%p188_p2), %vm226_vm1, %v1283_v3  ;;  %v1239_v6 = vld [vmem:[%s1531_s1 + $0x18] sm:$0xff] (!%p188_p2)   ;;  %vm265_vm5 = vcmask (!%p188_p2), 519168  }
   0x9   : > { %230 = vst.msk [vmem:[#allocation2 + $0x8] sm:$0x1] (!%p188_p2), %vm229_vm2, %v1283_v3  ;;  %233 = vst.msk [vmem:[#allocation3 + $0x8] sm:$0x1] (!%p188_p2), %vm229_vm2, %v1283_v3  ;;  %vm243_vm4 = vsmask.f32 (!%p188_p2), 4368 }
   0xa   : > { %vm266_vm6 = vsmask.f32 (!%p188_p2), 7938  ;;  %vm332_vm7 = vcmask (!%p188_p2), 1043456   ;;  %vm273_vm8 = vcmask (!%p188_p2), 516096   ;;  %vm1361_vm9 = vmor (!%p188_p2), %vm242_vm3, %vm243_vm4  ;;  %vm328_vm12 = vcmask (!%p188_p2), 588800   ;;  %v1242_v30 = vld [vmem:[%s1531_s1 + $0x24] sm:$0xff] (!%p188_p2)  }
   0xb   : > { %1134 = vmatpush3.bf16.msra.mxu0 (!%p188_p2), %v1237_v2  ;;  %vm1366_vm10 = vmand (!%p188_p2), %vm265_vm5, %vm266_vm6  ;;  %v334_v17 = vsel (!%p188_p2), %vm332_vm7, %v1240_v5, 0  ;;  %v1243_v34 = vld [vmem:[%s1531_s1 + $0x2c] sm:$0xff] (!%p188_p2)   ;;  %v1244_v36 = vld [vmem:[%s1531_s1 + $0x34] sm:$0xff] (!%p188_p2)   ;;  %vm400_vm13 = vsmask.f32 (!%p188_p2), 7424  ;;  %vm503_vm14 = vcmask (!%p188_p2), 1046528  }
   0xc   : > { %1135 = vmatprep.subr.bf16.mxu0 (!%p188_p2), %v1281_v1  ;;  %vm1372_vm11 = vmand (!%p188_p2), %vm273_vm8, %vm242_vm3  ;;  %v1245_v39 = vld [vmem:[%s1531_s1 + $0x3c] sm:$0xff] (!%p188_p2)   ;;  %v1246_v43 = vld [vmem:[%s1531_s1 + $0x44] ss:$0 sps:$4 sm:$0xff] (!%p188_p2)  }
   0xd   : > { %s1543_s19 = smov (!%p215_p3, %s988_s19), 1  ;;  %v444_v46 = vsel %vm332_vm7, %v1246_v43, 0  ;;  %v1249_v48 = vld [vmem:[%s1531_s1 + $0x48] sm:$0xff]   ;;  %v1250_v49 = vld [vmem:[%s1531_s1 + $0x50] sm:$0xff]   ;;  %v1251_v50 = vld [vmem:[%s1531_s1 + $0x58] sm:$0xff]  }
   0xe   : > { %s1087_s26 = sshll.u32 %s1543_s19, 4  ;;  %v268_v21 = vld [vmem:[#allocation2] sm:$0xf]  ;;  %v1253_v54 = vld [vmem:[%s1531_s1 + $0x68] ss:$0 sps:$4 sm:$0xff]   ;;  %v1256_v61 = vld [vmem:[%s1533_s3 + $0x10] sm:$0xff]  }
   0xf   : > { %s219_s6 = scalar_lea.vmem %s1530_s0, %s1087_s26  ;;  %1136 = vmatpush3.bf16.msra.mxu0 %v1238_v4  ;;  %v1252_v52 = vld [vmem:[%s1531_s1 + $0x60] sm:$0xff]   ;;  %v538_v57 = vsel %vm332_vm7, %v1253_v54, 0  ;;  %v1255_v60 = vld [vmem:[%s1533_s3 + $0x8] sm:$0xff]   ;;  %v1257_v62 = vld [vmem:[%s1533_s3 + $0x18] sm:$0xff]   ;;  %s1088_s17 = sshll.u32 %s1543_s19, 3 }
  0x10   : > { %v1351_v7 = vld [vmem:[%s219_s6] sm:$0xff]  ;;  %v1353_v8 = vld [vmem:[%s219_s6 + $0x8] sm:$0xff]  ;;  %1137 = vmatprep.subr.bf16.mxu0 %v1281_v1  ;;  %s224_s22 = scalar_lea.vmem %s1535_s5, %s1088_s17 }
  0x11   : > { %v1089_v9 = vpack.c.bf16 %v1351_v7, %v1351_v7  ;;  %v1090_v10 = vpack.c.bf16 %v1353_v8, %v1353_v8  ;;  %v275_v22 = vld [vmem:[#allocation2 + $0x8] sm:$0x1]  ;;  %v1254_v59 = vld [vmem:[%s1533_s3] sm:$0xff]   ;;  %v1261_v11 = vld [vmem:[%s1533_s3 + $0x2c] sm:$0xff]  }
  0x12   : > { %1174 = vmatpush3.bf16.msra.mxu1 %v1254_v59  ;;  %v1258_v63 = vld [vmem:[%s1533_s3 + $0x20] ss:$0 sps:$4 sm:$0xff]  }
  0x13   : > { %v246_v12 = vshrl.u32 %v1089_v9, 16  ;;  %v249_v13 = vshll.u32 %v1089_v9, 16  ;;  %v254_v14 = vshrl.u32 %v1090_v10, 16  ;;  %v257_v15 = vshll.u32 %v1090_v10, 16  ;;  %1138 = vmatpush3.bf16.msra.mxu0 %v1239_v6  ;;  %1175 = vmatprep.subr.bf16.mxu1 %v1281_v1  ;;  %v999_v2 = vld [vmem:[%s1532_s2] ss:$0 sm:$0xff] }
  0x14   : > { %1139 = vmatprep.subr.bf16.mxu0 %v1281_v1  ;;  %v672_v0 = vsel %vm332_vm7, %v1258_v63, 0  ;;  %v1042_v63 = vld [vmem:[%s1534_s4] ss:$0 sm:$0xff] }
  0x15   : > { %v248_v18 = vrot.slane %v246_v12, 7  ;;  %v256_v19 = vrot.slane %v254_v14, 7 }
  0x16   : > { %1176 = vmatpush3.bf16.msra.mxu1 %v1255_v60 }
  0x17   : > { %v251_v23 = vor.u32 %v249_v13, %v248_v18  ;;  %v252_v24 = vrot.slane %v248_v18, 4  ;;  %v259_v25 = vor.u32 %v257_v15, %v256_v19  ;;  %v261_v26 = vrot.slane %v256_v19, 4  ;;  %1140 = vmatpush3.bf16.msra.mxu0 %v334_v17  ;;  %1177 = vmatprep.subr.bf16.mxu1 %v1281_v1 }
  0x18   : > { %1145 = vmatprep.subr.bf16.mxu0 %v1281_v1 }
  0x19   : > { %v260_v27 = vsel %vm1361_vm9, %v252_v24, %v259_v25  ;;  %v269_v28 = vsel %vm1366_vm10, %v251_v23, %v268_v21  ;;  %v276_v29 = vsel %vm1372_vm11, %v261_v26, %v275_v22  ;;  %v611_v22 = vld [vmem:[#allocation3] sm:$0xf]  ;;  %v615_v26 = vld [vmem:[#allocation3 + $0x8] sm:$0x1] }
  0x1a   : > { %270 = vst [vmem:[#allocation2] sm:$0xf] %v269_v28  ;;  %272 = vst.msk [vmem:[#allocation2 + $0x4] sm:$0xf] %vm265_vm5, %v260_v27  ;;  %1178 = vmatpush3.bf16.msra.mxu1 %v1256_v61 }
  0x1b   : > { %277 = vst [vmem:[#allocation2 + $0x8] sm:$0x1] %v276_v29  ;;  %1179 = vmatprep.subr.bf16.mxu1 %v1281_v1 }
  0x1e   : > { %1180 = vmatpush3.bf16.msra.mxu1 %v1257_v62 }
  0x1f   : > { %1181 = vmatprep.subr.bf16.mxu1 %v1281_v1 }
  0x21   : > { %v1241_v31 = vld [vmem:[#allocation2] sm:$0xff]  }
  0x22   : > { %v379_v32 = vld [vmem:[#allocation2] sm:$0xf]  ;;  %v380_v33 = vld [vmem:[#allocation2 + $0x4] sm:$0xf]  ;;  %1142 = vmatmul.mubr.msk.bf16.vlgmr.msra.gmra.mrb[0].mxu0 %vm328_vm12, %v1241_v31  ;;  %1182 = vmatpush3.bf16.msra.mxu1 %v672_v0 }
  0x23   : > { %1146 = vmatpush3.bf16.msra.mxu0 %v1242_v30  ;;  %1155 = vmatprep.mubr.msk.bf16.mxu0 %vm1282_vm0, %v1281_v1  ;;  %v1016_v35 = vcombine.low %v379_v32, %v380_v33  ;;  %v1248_v37 = vld [vmem:[#allocation2 + $0x8] ss:$0 sps:$4 sm:$0x11]   ;;  %v489_v51 = vld [vmem:[#allocation2] sm:$0xe] }
  0x24   : > { %1147 = vmatprep.subr.bf16.mxu0 %v1281_v1  ;;  %v409_v42 = vshll.u32 %v1248_v37, 16  ;;  %v1033_v53 = vcombine.low %v489_v51, %v380_v33  ;;  %v505_v56 = vrot.slane %v1248_v37, 1  ;;  %1187 = vmatprep.subr.bf16.mxu1 %v1281_v1  ;;  %v1260_v33 = vld [vmem:[%s1533_s3 + $0x24] sm:$0xff]  }
  0x25   : > { %v404_v38 = vshll.u32 %v1016_v35, 16  ;;  %v402_v40 = vshrl.u32 %v1016_v35, 16  ;;  %v1270_v51 = vld [vmem:[%s1533_s3 + $0x60] sm:$0xff]  }
  0x26   : > { %v411_v45 = vrot.slane %v409_v42, 1  ;;  %v504_v55 = vrot.slane %v1033_v53, 1 }
  0x27   : > { %1148 = vmatpush3.bf16.msra.mxu0 %v1243_v34  ;;  %v406_v41 = vrot.slane %v404_v38, 1  ;;  %v1263_v38 = vld [vmem:[%s1533_s3 + $0x3c] sm:$0xff]  }
  0x28   : > { %1149 = vmatprep.subr.bf16.mxu0 %v1281_v1  ;;  %v506_v58 = vsel %vm503_vm14, %v504_v55, %v505_v56 }
  0x29   : > { %v407_v44 = vor.u32 %v406_v41, %v402_v40  ;;  %v1264_v40 = vld [vmem:[%s1533_s3 + $0x44] ss:$0 sps:$4 sm:$0xff]  }
  0x2b   : > { %1150 = vmatpush3.bf16.msra.mxu0 %v1244_v36  ;;  %v412_v47 = vsel %vm400_vm13, %v407_v44, %v411_v45  ;;  %v1262_v36 = vld [vmem:[%s1533_s3 + $0x34] sm:$0xff]   ;;  %v781_v44 = vsel %vm332_vm7, %v1264_v40, 0 }
  0x2c   : > { %1151 = vmatprep.subr.bf16.mxu0 %v1281_v1 }
  0x2f   : > { %1152 = vmatpush3.bf16.msra.mxu0 %v1245_v39 }
  0x30   : > { %1153 = vmatprep.subr.bf16.mxu0 %v1281_v1 }
  0x33   : > { %1154 = vmatpush3.bf16.msra.mxu0 %v444_v46 }
  0x34   : > { %1159 = vmatprep.subr.bf16.mxu0 %v1281_v1 }
  0x36   : > { %1156 = vmatmul.mubr.msk.bf16.vlgmr.msra.gmra.mrb[0].mxu0 %vm328_vm12, %v412_v47  ;;  %v1267_v47 = vld [vmem:[%s1533_s3 + $0x48] sm:$0xff]  }
  0x37   : > { %1160 = vmatpush3.bf16.msra.mxu0 %v1249_v48  ;;  %1169 = vmatprep.mubr.msk.bf16.mxu0 %vm1282_vm0, %v1281_v1 }
  0x38   : > { %1161 = vmatprep.subr.bf16.mxu0 %v1281_v1 }
  0x3b   : > { %1162 = vmatpush3.bf16.msra.mxu0 %v1250_v49  ;;  %v1268_v49 = vld [vmem:[%s1533_s3 + $0x50] sm:$0xff]  }
  0x3c   : > { %1163 = vmatprep.subr.bf16.mxu0 %v1281_v1 }
  0x3f   : > { %1164 = vmatpush3.bf16.msra.mxu0 %v1251_v50  ;;  %v1269_v50 = vld [vmem:[%s1533_s3 + $0x58] sm:$0xff]  }
  0x40   : > { %1165 = vmatprep.subr.bf16.mxu0 %v1281_v1 }
  0x43   : > { %1166 = vmatpush3.bf16.msra.mxu0 %v1252_v52  ;;  %v1271_v52 = vld [vmem:[%s1533_s3 + $0x68] ss:$0 sps:$4 sm:$0xff]  }
  0x44   : > { %1167 = vmatprep.subr.bf16.mxu0 %v1281_v1  ;;  %v874_v55 = vsel %vm332_vm7, %v1271_v52, 0 }
  0x47   : > { %1168 = vmatpush3.bf16.msra.mxu0 %v538_v57 }
  0x4a   : > { %1170 = vmatmul.mubr.msk.bf16.vlgmr.msra.gmra.mrb[0].mxu0 %vm328_vm12, %v506_v58 }
 0x11d   : > { %v574_v3 = vpop.f32.mrb[0].mxu0 }
 0x11e   : > { %v1215_v4 = vadd.f32 %v999_v2, %v574_v3  ;;  %v1171_v5 = vpop.f32.mrb[1].mxu0 }
 0x11f   : > { %v577_v6 = vpop.f32.mrb[2].mxu0 }
 0x120   : > { %v583_v9 = vmax.f32 %v1215_v4, 0.0  ;;  %v1216_v10 = vadd.f32 %v999_v2, %v577_v6  ;;  %v1172_v12 = vpop.f32.mrb[3].mxu0 }
 0x122   : > { %v1091_v13 = vpack.c.bf16 %v583_v9, %v583_v9  ;;  %v584_v14 = vmax.f32 %v1216_v10, 0.0 }
 0x124   : > { %v592_v15 = vshrl.u32 %v1091_v13, 16  ;;  %v1092_v17 = vpack.c.bf16 %v584_v14, %v584_v14  ;;  %v595_v19 = vshll.u32 %v1091_v13, 16 }
 0x126   : > { %v594_v18 = vrot.slane %v592_v15, 7  ;;  %v600_v21 = vshrl.u32 %v1092_v17, 16  ;;  %v603_v25 = vshll.u32 %v1092_v17, 16 }
 0x128   : > { %v597_v23 = vor.u32 %v595_v19, %v594_v18  ;;  %v602_v24 = vrot.slane %v600_v21, 7  ;;  %v598_v27 = vrot.slane %v594_v18, 4 }
 0x12a   : > { %v612_v28 = vsel %vm1366_vm10, %v597_v23, %v611_v22  ;;  %v605_v29 = vor.u32 %v603_v25, %v602_v24  ;;  %v607_v30 = vrot.slane %v602_v24, 4 }
 0x12b   : > { %613 = vst [vmem:[#allocation3] sm:$0xf] %v612_v28 }
 0x12c   : > { %v606_v31 = vsel %vm1361_vm9, %v598_v27, %v605_v29  ;;  %v616_v32 = vsel %vm1372_vm11, %v607_v30, %v615_v26 }
 0x12d   : > { %614 = vst.msk [vmem:[#allocation3 + $0x4] sm:$0xf] %vm265_vm5, %v606_v31  ;;  %617 = vst [vmem:[#allocation3 + $0x8] sm:$0x1] %v616_v32 }
 0x132   : > { %v717_v20 = vld [vmem:[#allocation3] sm:$0xf] }
 0x133   : > { %v826_v53 = vld [vmem:[#allocation3] sm:$0xe] }
 0x134   : > { %v1259_v34 = vld [vmem:[#allocation3] sm:$0xff]   ;;  %v1266_v39 = vld [vmem:[#allocation3 + $0x8] ss:$0 sps:$4 sm:$0x11]  }
 0x135   : > { %1184 = vmatmul.mubr.msk.bf16.vlgmr.msra.gmra.mrb[0].mxu1 %vm328_vm12, %v1259_v34  ;;  %v718_v16 = vld [vmem:[#allocation3 + $0x4] sm:$0xf]  ;;  %v746_v43 = vshll.u32 %v1266_v39, 16  ;;  %v841_v57 = vrot.slane %v1266_v39, 1 }
 0x136   : > { %1188 = vmatpush3.bf16.msra.mxu1 %v1260_v33  ;;  %1197 = vmatprep.mubr.msk.bf16.mxu1 %vm1282_vm0, %v1281_v1  ;;  %v1059_v35 = vcombine.low %v717_v20, %v718_v16  ;;  %v1076_v54 = vcombine.low %v826_v53, %v718_v16 }
 0x137   : > { %1189 = vmatprep.subr.bf16.mxu1 %v1281_v1  ;;  %v748_v46 = vrot.slane %v746_v43, 1 }
 0x138   : > { %v741_v37 = vshll.u32 %v1059_v35, 16  ;;  %v739_v42 = vshrl.u32 %v1059_v35, 16  ;;  %v840_v56 = vrot.slane %v1076_v54, 1 }
 0x13a   : > { %1190 = vmatpush3.bf16.msra.mxu1 %v1261_v11  ;;  %v743_v41 = vrot.slane %v741_v37, 1  ;;  %v842_v58 = vsel %vm503_vm14, %v840_v56, %v841_v57 }
 0x13b   : > { %1191 = vmatprep.subr.bf16.mxu1 %v1281_v1 }
 0x13c   : > { %v744_v45 = vor.u32 %v743_v41, %v739_v42 }
 0x13e   : > { %1192 = vmatpush3.bf16.msra.mxu1 %v1262_v36  ;;  %v749_v48 = vsel %vm400_vm13, %v744_v45, %v748_v46 }
 0x13f   : > { %1193 = vmatprep.subr.bf16.mxu1 %v1281_v1 }
 0x142   : > { %1194 = vmatpush3.bf16.msra.mxu1 %v1263_v38 }
 0x143   : > { %1195 = vmatprep.subr.bf16.mxu1 %v1281_v1 }
 0x146   : > { %1196 = vmatpush3.bf16.msra.mxu1 %v781_v44 }
 0x147   : > { %1201 = vmatprep.subr.bf16.mxu1 %v1281_v1 }
 0x149   : > { %1198 = vmatmul.mubr.msk.bf16.vlgmr.msra.gmra.mrb[4].mxu1 %vm328_vm12, %v749_v48 }
 0x14a   : > { %1202 = vmatpush3.bf16.msra.mxu1 %v1267_v47  ;;  %1211 = vmatprep.mubr.msk.bf16.mxu1 %vm1282_vm0, %v1281_v1 }
 0x14b   : > { %1203 = vmatprep.subr.bf16.mxu1 %v1281_v1 }
 0x14e   : > { %1204 = vmatpush3.bf16.msra.mxu1 %v1268_v49 }
 0x14f   : > { %1205 = vmatprep.subr.bf16.mxu1 %v1281_v1 }
 0x152   : > { %1206 = vmatpush3.bf16.msra.mxu1 %v1269_v50 }
 0x153   : > { %1207 = vmatprep.subr.bf16.mxu1 %v1281_v1 }
 0x156   : > { %1208 = vmatpush3.bf16.msra.mxu1 %v1270_v51 }
 0x157   : > { %1209 = vmatprep.subr.bf16.mxu1 %v1281_v1 }
 0x15a   : > { %1210 = vmatpush3.bf16.msra.mxu1 %v874_v55 }
 0x15d   : > { %1212 = vmatmul.mubr.msk.bf16.vlgmr.msra.gmra.mrb[8].mxu1 %vm328_vm12, %v842_v58 }
 0x208   : > { %v708_v59 = vpop.f32.mrb[0].mxu1 }
 0x209   : > { %v1185_v60 = vpop.f32.mrb[1].mxu1  ;;  %v715_v0 = vadd.f32 %v1042_v63, %v708_v59 }
 0x20a   : > { %v711_v61 = vpop.f32.mrb[2].mxu1 }
 0x20b   : > { %v1186_v62 = vpop.f32.mrb[3].mxu1  ;;  %v716_v2 = vadd.f32 %v1042_v63, %v711_v61 }
 0x21c   : > { %v817_v1 = vpop.f32.mrb[4].mxu1 }
 0x21d   : > { %v824_v3 = vadd.f32 %v817_v1, %v715_v0  ;;  %v1199_v4 = vpop.f32.mrb[5].mxu1 }
 0x21e   : > { %v820_v5 = vpop.f32.mrb[6].mxu1 }
 0x21f   : > { %v825_v6 = vadd.f32 %v820_v5, %v716_v2  ;;  %v1200_v9 = vpop.f32.mrb[7].mxu1 }
 0x230   : > { %v910_v10 = vpop.f32.mrb[8].mxu1 }
 0x231   : > { %v917_v12 = vadd.f32 %v910_v10, %v824_v3  ;;  %v1213_v13 = vpop.f32.mrb[9].mxu1 }
 0x232   : > { %v913_v14 = vpop.f32.mrb[10].mxu1 }
 0x233   : > { %v919_v15 = vadd.f32 %v917_v12, %v1351_v7  ;;  %v918_v17 = vadd.f32 %v913_v14, %v825_v6  ;;  %v1214_v18 = vpop.f32.mrb[11].mxu1 }
 0x235   : > { %v921_v19 = vmax.f32 %v919_v15, 0.0  ;;  %v920_v21 = vadd.f32 %v918_v17, %v1353_v8 }
 0x237   : > { %v1093_v22 = vpack.c.bf16 %v921_v19, %v921_v19  ;;  %v922_v23 = vmax.f32 %v920_v21, 0.0 }
 0x239   : > { %931 = vst.msk [vmem:[%s224_s22] sm:$0xf] %vm265_vm5, %v1093_v22  ;;  %v1094_v24 = vpack.c.bf16 %v922_v23, %v922_v23 }
 0x23b   : > { %932 = vst.msk [vmem:[%s224_s22 + $0x4] sm:$0xf] %vm265_vm5, %v1094_v24 }
 0x23c PF: > { %s15_s18 = sadd.s32 1, %s1279_s18  }
 0x23d   : > { %p12_p4 = scmp.ge.s32.totalorder %s15_s18, 4  }
 0x23f   :  { %14 = sbr.rel (!%p12_p4) target bundleno = 1 (0x1), region = 74 }

</bundles_post_ra>
